<compile_context>
chip_gen: v5e
topology: v5e:2x2
jax: 0.10.0
libtpu: 0.0.40
codegen_flags: <defaults>
</compile_context>

<pallas_src>
import jax
import jax.numpy as jnp
from jax.experimental import pallas as pl
from jax.experimental.pallas import tpu as pltpu


_VMEM_LIMIT_BYTES = 32 * 1024 * 1024      # safe on v5e/v6e/v7x
_ONEHOT_TILE_BUDGET_BYTES = 8 * 1024 * 1024
_GATHER_TILE_BUDGET_BYTES = 8 * 1024 * 1024
_MATMUL_MAX_TABLE_BYTES = 4 * 1024 * 1024
_MATMUL_MAX_VOCAB = 2048


def _round_up(x, m):
    return (x + m - 1) // m * m


# ---------------------------------------------------------------------------
# Path 1: small vocabulary — one-hot matmul with VMEM-resident table.
# ---------------------------------------------------------------------------

def _embedding_onehot_kernel(idx_ref, table_ref, out_ref):
    # idx_ref:   (TN, 1)  int32
    # table_ref: (V, D)   f32/bf16 (resident, single-buffered)
    # out_ref:   (TN, D)  f32
    idx = idx_ref[...]                                       # (TN, 1)
    tn = idx.shape[0]
    v = table_ref.shape[0]
    # compare in int32 (v5e has no bf16 VALU), cast only at the end
    iota = jax.lax.broadcasted_iota(jnp.int32, (tn, v), 1)
    onehot = (idx == iota).astype(table_ref.dtype)           # (TN, V)
    out_ref[...] = jnp.dot(
        onehot, table_ref[...], preferred_element_type=jnp.float32
    ).astype(out_ref.dtype)


def _pick_onehot_tile(n, v, d, itemsize):
    # per-token VMEM bytes per step: ~2x one-hot row + 2x (double-buffered)
    # output row + index. Keep the step footprint well under the VMEM limit.
    per_row = 2 * v * 4 + 2 * d * 4 + max(itemsize, 4) + 8
    t = max(8, _ONEHOT_TILE_BUDGET_BYTES // per_row)
    t = min(t, 512)
    t = (t // 128) * 128 if t >= 128 else (t // 8) * 8
    n_pad8 = _round_up(n, 8)
    if t >= n_pad8:
        t = n_pad8                      # tiny problem: single grid step
    return max(t, 8)


def _embedding_onehot(X, table, *, use_bf16=False):
    B, S = X.shape
    V, D = table.shape
    out_dtype = table.dtype
    mxu_table = table.astype(jnp.bfloat16) if use_bf16 else table
    itemsize = jnp.dtype(mxu_table.dtype).itemsize

    N = B * S
    tile_n = _pick_onehot_tile(N, V, D, itemsize)
    n_pad = _round_up(N, tile_n)

    idx = jnp.clip(X.reshape(N).astype(jnp.int32), 0, V - 1)
    idx = jnp.pad(idx, (0, n_pad - N))          # padded tokens read row 0
    idx_2d = idx.reshape(n_pad, 1)

    grid = (n_pad // tile_n,)
    cost = pl.CostEstimate(
        flops=2 * n_pad * V * D,
        transcendentals=0,
        bytes_accessed=V * D * itemsize
        + n_pad * 4
        + n_pad * D * jnp.dtype(out_dtype).itemsize,
    )

    def call(table_pipeline_mode):
        spec_kwargs = {}
        if table_pipeline_mode is not None:
            spec_kwargs["pipeline_mode"] = table_pipeline_mode
        table_spec = pl.BlockSpec((V, D), lambda i: (0, 0), **spec_kwargs)
        return pl.pallas_call(
            _embedding_onehot_kernel,
            out_shape=jax.ShapeDtypeStruct((n_pad, D), out_dtype),
            grid_spec=pltpu.PrefetchScalarGridSpec(
                num_scalar_prefetch=0,
                grid=grid,
                in_specs=[
                    pl.BlockSpec((tile_n, 1), lambda i: (i, 0)),  # index tile
                    table_spec,                                   # full table
                ],
                out_specs=pl.BlockSpec((tile_n, D), lambda i: (i, 0)),
            ),
            compiler_params=pltpu.CompilerParams(
                dimension_semantics=("parallel",),
                vmem_limit_bytes=_VMEM_LIMIT_BYTES,
            ),
            cost_estimate=cost,
        )(idx_2d, mxu_table)

    try:
        # Table block index never changes -> single-buffer it (halves its VMEM).
        out = call(pl.Buffered(1))
    except Exception:
        # TODO(synk): fallback if this jax build rejects single-buffered mode.
        out = call(None)

    return out[:N].reshape(B, S, D)


# ---------------------------------------------------------------------------
# Path 2: general vocabulary — scalar-prefetch + DMA row gather (HBM-bound).
# ---------------------------------------------------------------------------

def _embedding_gather_kernel(idx_smem, table_hbm, out_ref, row_buf, sem):
    # idx_smem:  (n_pad,)   int32 in SMEM (scalar prefetch)
    # table_hbm: (V, D)     table left in HBM (pl.ANY)
    # out_ref:   (TN, D)    output tile (VMEM, pipelined)
    # row_buf:   (TN, D)    VMEM scratch gathered into via DMA
    # sem:       (1,)       DMA semaphore
    tile_n, _ = row_buf.shape
    base = pl.program_id(0) * tile_n

    def issue(r, carry):
        row = idx_smem[base + r]
        pltpu.make_async_copy(
            table_hbm.at[pl.ds(row, 1), :],
            row_buf.at[pl.ds(r, 1), :],
            sem.at[0],
        ).start()
        return carry

    jax.lax.fori_loop(0, tile_n, issue, 0)

    def drain(r, carry):
        pltpu.make_async_copy(
            table_hbm.at[pl.ds(0, 1), :],      # dummy src of matching shape
            row_buf.at[pl.ds(r, 1), :],
            sem.at[0],
        ).wait()
        return carry

    jax.lax.fori_loop(0, tile_n, drain, 0)
    out_ref[...] = row_buf[...]


def _pick_gather_tile(n, d, itemsize):
    per_row = 3 * d * itemsize + 16     # 1x scratch + 2x double-buffered out
    t = max(8, _GATHER_TILE_BUDGET_BYTES // per_row)
    t = min(t, 256)
    t = (t // 8) * 8
    n_pad8 = _round_up(n, 8)
    if t >= n_pad8:
        t = n_pad8
    return max(t, 8)


def _embedding_gather(X, table):
    B, S = X.shape
    V, D = table.shape
    itemsize = jnp.dtype(table.dtype).itemsize
    N = B * S
    tile_n = _pick_gather_tile(N, D, itemsize)
    n_pad = _round_up(N, tile_n)

    idx = jnp.clip(X.reshape(N).astype(jnp.int32), 0, V - 1)
    idx = jnp.pad(idx, (0, n_pad - N))

    grid = (n_pad // tile_n,)
    out = pl.pallas_call(
        _embedding_gather_kernel,
        out_shape=jax.ShapeDtypeStruct((n_pad, D), table.dtype),
        grid_spec=pltpu.PrefetchScalarGridSpec(
            num_scalar_prefetch=1,
            grid=grid,
            in_specs=[pl.BlockSpec(memory_space=pl.ANY)],   # table stays in HBM
            out_specs=pl.BlockSpec((tile_n, D), lambda i, idx_ref: (i, 0)),
            scratch_shapes=[
                pltpu.VMEM((tile_n, D), table.dtype),
                pltpu.SemaphoreType.DMA((1,)),
            ],
        ),
        compiler_params=pltpu.CompilerParams(
            dimension_semantics=("parallel",),
            vmem_limit_bytes=_VMEM_LIMIT_BYTES,
        ),
        cost_estimate=pl.CostEstimate(
            flops=0,
            transcendentals=0,
            bytes_accessed=2 * n_pad * D * itemsize + n_pad * 4,
        ),
    )(idx, table)

    return out[:N].reshape(B, S, D)


# ---------------------------------------------------------------------------
# Public entry point (matches nn.Embedding.forward).
# ---------------------------------------------------------------------------

def embedding_forward(X, table, *, use_bf16_matmul=False, force_gather=False):
    """X: int [B, S]; table: float32 [V, D] -> float32 [B, S, D]."""
    V, D = table.shape
    table_bytes = V * D * jnp.dtype(table.dtype).itemsize
    small_vocab = (V <= _MATMUL_MAX_VOCAB
                   and table_bytes <= _MATMUL_MAX_TABLE_BYTES)
    if small_vocab and not force_gather:
        return _embedding_onehot(X, table, use_bf16=use_bf16_matmul)
    return _embedding_gather(X, table)


if __name__ == "__main__":
    # Module config (small): candi_dim=64, emb_dim=128, batch=2, seq=8
    candi_dim, emb_dim = 64, 128
    B, S = 2, 8

    key = jax.random.PRNGKey(0)
    k_w, k_x = jax.random.split(key)

    # nn.Embedding default init: weight ~ N(0, 1)
    table = jax.random.normal(k_w, (candi_dim, emb_dim), dtype=jnp.float32)
    X = jax.random.randint(k_x, (B, S), 0, candi_dim, dtype=jnp.int32)

    ref = table[X]

    # 1) default dispatch (small vocab -> VMEM-resident one-hot matmul path)
    out = jax.block_until_ready(embedding_forward(X, table))
    assert out.shape == (B, S, emb_dim)
    assert jnp.allclose(out, ref, atol=1e-5, rtol=1e-5)

    # 2) large-vocab DMA row-gather path (forced on the same small inputs)
    out_gather = jax.block_until_ready(embedding_forward(X, table,
                                                         force_gather=True))
    assert out_gather.shape == (B, S, emb_dim)
    assert jnp.array_equal(out_gather, ref)          # pure copy: bit exact

    # 3) optional bf16-table MXU path (v6e/v7x friendly), loose tolerance
    out_bf16 = jax.block_until_ready(
        embedding_forward(X, table, use_bf16_matmul=True))
    assert jnp.allclose(out_bf16, ref, atol=5e-2, rtol=5e-2)

    print("KERNEL_OK")
</pallas_src>

<mosaic_0001>
module attributes {stable_mosaic.version = 11 : i64} {
  func.func @_embedding_onehot_kernel(%arg0: i32, %arg1: memref<16x1xi32, #tpu.memory_space<vmem>>, %arg2: memref<64x128xf32, #tpu.memory_space<vmem>>, %arg3: memref<16x128xf32, #tpu.memory_space<vmem>>) attributes {dimension_semantics = [#tpu.dimension_semantics<parallel>], iteration_bounds = array<i64: 1>, scalar_prefetch = 0 : i64, scratch_operands = 0 : i64, tpu.core_type = #tpu.core_type<tc>, window_params = [{transform_indices = @transform_0, window_bounds = array<i64: 16, 1>}, {pipeline_mode = #tpu.pipeline_mode<synchronous>, transform_indices = @transform_1, window_bounds = array<i64: 64, 128>}, {transform_indices = @transform_2, window_bounds = array<i64: 16, 128>}]} {
    %c0 = arith.constant 0 : index
    %c0_0 = arith.constant 0 : index
    %0 = vector.load %arg1[%c0, %c0_0] : memref<16x1xi32, #tpu.memory_space<vmem>>, vector<16x1xi32>
    %1 = tpu.iota {dimensions = array<i32: 1>} : vector<16x64xi32>
    %2 = vector.broadcast %0 : vector<16x1xi32> to vector<16x64xi32>
    %3 = arith.cmpi eq, %2, %1 : vector<16x64xi32>
    %4 = arith.extui %3 : vector<16x64xi1> to vector<16x64xi32>
    %5 = arith.sitofp %4 : vector<16x64xi32> to vector<16x64xf32>
    %c0_1 = arith.constant 0 : index
    %c0_2 = arith.constant 0 : index
    %6 = vector.load %arg2[%c0_1, %c0_2] : memref<64x128xf32, #tpu.memory_space<vmem>>, vector<64x128xf32>
    %cst = arith.constant dense<0.000000e+00> : vector<16x128xf32>
    %7 = tpu.matmul %5, %6, %cst {dimension_numbers = #tpu.dot_dimension_numbers<[1], [0], [0], [1], [0, 0, 1, 1], [], []>} : vector<16x64xf32>, vector<64x128xf32>, vector<16x128xf32> -> vector<16x128xf32>
    %c0_3 = arith.constant 0 : index
    %c0_4 = arith.constant 0 : index
    %8 = vector.load %arg3[%c0_3, %c0_4] : memref<16x128xf32, #tpu.memory_space<vmem>>, vector<16x128xf32>
    tpu.vector_store %arg3[%c0_3, %c0_4], %7 {strides = array<i32>} : memref<16x128xf32, #tpu.memory_space<vmem>>, vector<16x128xf32>,
    return
  }
  func.func @transform_0(%arg0: i32) -> (i32, i32) {
    %c0_i32 = arith.constant 0 : i32
    %c0_i32_0 = arith.constant 0 : i32
    return %arg0, %c0_i32 : i32, i32
  }
  func.func @transform_1(%arg0: i32) -> (i32, i32) {
    %c0_i32 = arith.constant 0 : i32
    %c0_i32_0 = arith.constant 0 : i32
    %c0_i32_1 = arith.constant 0 : i32
    return %c0_i32, %c0_i32_0 : i32, i32
  }
  func.func @transform_2(%arg0: i32) -> (i32, i32) {
    %c0_i32 = arith.constant 0 : i32
    %c0_i32_0 = arith.constant 0 : i32
    return %arg0, %c0_i32 : i32, i32
  }
}

module attributes {stable_mosaic.version = 11 : i64} {
  func.func @_embedding_onehot_kernel(%arg0: i32, %arg1: memref<16x1xi32, #tpu.memory_space<vmem>>, %arg2: memref<64x128xf32, #tpu.memory_space<vmem>>, %arg3: memref<16x128xf32, #tpu.memory_space<vmem>>) attributes {dimension_semantics = [#tpu.dimension_semantics<parallel>], iteration_bounds = array<i64: 1>, scalar_prefetch = 0 : i64, scratch_operands = 0 : i64, tpu.core_type = #tpu.core_type<tc>, window_params = [{transform_indices = @transform_0, window_bounds = array<i64: 16, 1>}, {pipeline_mode = #tpu.pipeline_mode<synchronous>, transform_indices = @transform_1, window_bounds = array<i64: 64, 128>}, {transform_indices = @transform_2, window_bounds = array<i64: 16, 128>}]} {
    %c0 = arith.constant 0 : index
    %c0_0 = arith.constant 0 : index
    %0 = vector.load %arg1[%c0, %c0_0] : memref<16x1xi32, #tpu.memory_space<vmem>>, vector<16x1xi32>
    %1 = tpu.iota {dimensions = array<i32: 1>} : vector<16x64xi32>
    %2 = vector.broadcast %0 : vector<16x1xi32> to vector<16x64xi32>
    %3 = arith.cmpi eq, %2, %1 : vector<16x64xi32>
    %4 = arith.extui %3 : vector<16x64xi1> to vector<16x64xi32>
    %5 = arith.sitofp %4 : vector<16x64xi32> to vector<16x64xf32>
    %c0_1 = arith.constant 0 : index
    %c0_2 = arith.constant 0 : index
    %6 = vector.load %arg2[%c0_1, %c0_2] : memref<64x128xf32, #tpu.memory_space<vmem>>, vector<64x128xf32>
    %cst = arith.constant dense<0.000000e+00> : vector<16x128xf32>
    %7 = tpu.matmul %5, %6, %cst {dimension_numbers = #tpu.dot_dimension_numbers<[1], [0], [0], [1], [0, 0, 1, 1], [], []>} : vector<16x64xf32>, vector<64x128xf32>, vector<16x128xf32> -> vector<16x128xf32>
    %c0_3 = arith.constant 0 : index
    %c0_4 = arith.constant 0 : index
    %8 = vector.load %arg3[%c0_3, %c0_4] : memref<16x128xf32, #tpu.memory_space<vmem>>, vector<16x128xf32>
    tpu.vector_store %arg3[%c0_3, %c0_4], %7 {strides = array<i32>} : memref<16x128xf32, #tpu.memory_space<vmem>>, vector<16x128xf32>,
    return
  }
  func.func @transform_0(%arg0: i32) -> (i32, i32) {
    %c0_i32 = arith.constant 0 : i32
    %c0_i32_0 = arith.constant 0 : i32
    return %arg0, %c0_i32 : i32, i32
  }
  func.func @transform_1(%arg0: i32) -> (i32, i32) {
    %c0_i32 = arith.constant 0 : i32
    %c0_i32_0 = arith.constant 0 : i32
    %c0_i32_1 = arith.constant 0 : i32
    return %c0_i32, %c0_i32_0 : i32, i32
  }
  func.func @transform_2(%arg0: i32) -> (i32, i32) {
    %c0_i32 = arith.constant 0 : i32
    %c0_i32_0 = arith.constant 0 : i32
    return %arg0, %c0_i32 : i32, i32
  }
}

</mosaic_0001>

<bundles_post_ra>
// kernel: tpu_custom_call.1
= control target key start
LH: loop header
LB: loop body
LE: loop exit
PB: predicated region body
PF: predicated region fallthrough
CT: control target
= control target key end

     0   :  { %7 = vsyncpa [#allocation3], 0  ;;  %s213_s0 = inlined_call_operand.vmem [shape: s32[16,1], index: 0, kind: input, shape index: {}]   ;;  %s214_s1 = inlined_call_operand.hbm [shape: f32[64,128], index: 1, kind: input, shape index: {}]   ;;  %s215_s2 = inlined_call_operand.hbm [shape: f32[16,128], index: 2, kind: output, shape index: {}]  }
   0x1   :  { %8 = vsyncpa [#allocation4], 0  ;;  %s15_s11 = sshll.u32 %s214_s1, 4  ;;  %s174_s12 = smov [#allocation2]   ;;  %s16_s11 = int_to_ptr.hbm [resolvable:$true] %s15_s11 }
   0x2   :  { %s17_s13 = sshll.u32 %s174_s12, 4  ;;  %s175_s14 = smov 128   ;;  %s18_s13 = int_to_ptr.vmem [resolvable:$true] %s17_s13 }
   0x3   :  { %s176_s15 = smov 8  }
   0x4   :  { %23 = dma.hbm_to_vmem [thread:$0]  %s16_s11, 1024, %s18_s13, [#allocation3], %s175_s14, %s175_s14, %s176_s15  }
   0x5   :  { %170 = dma.done.wait [#allocation3], 1024  }
   0x6   :  { %171 = vsyncadd [#allocation3], 4294966272  ;;  %v177_v0 = vmov 0   ;;  %v28_v1 = vld [vmem:[%s213_s0] sm:$0xff]  ;;  %v51_v2 = vld [vmem:[#allocation2 + $0x38] sm:$0xff]  ;;  %v30_v11 = vlaneseq  ;;  %vm52_vm0 = vcmask 523264  }
   0x7   :  { %121 = vset.pattern.permute.xlu0 %v177_v0  ;;  %67 = vmatpush.msra.mxu0 %v51_v2  ;;  %v50_v3 = vld [vmem:[#allocation2 + $0x30] sm:$0xff]  ;;  %v49_v4 = vld [vmem:[#allocation2 + $0x28] sm:$0xff]  ;;  %v48_v5 = vld [vmem:[#allocation2 + $0x20] sm:$0xff]  ;;  %v178_v14 = vmov 0.0   ;;  %s90_s22 = sshll.u32 %s215_s2, 4  ;;  %s91_s22 = int_to_ptr.hbm [resolvable:$true] %s90_s22 }
   0x8   :  { %33 = vperm.xlu0 %121, %v28_v1   ;;  %107 = vmatpush.msra.mxu1 %v51_v2  ;;  %v29_v6 = vld [vmem:[%s213_s0 + $0x8] sm:$0xff]  ;;  %v47_v7 = vld [vmem:[#allocation2 + $0x18] sm:$0xff]  ;;  %v46_v8 = vld [vmem:[#allocation2 + $0x10] sm:$0xff]  ;;  %v31_v12 = vand.u32 127, %v30_v11  ;;  %s179_s0 = smov [#allocation5]  }
   0x9   :  { %68 = vmatpush.msra.mxu0 %v50_v3  ;;  %v45_v9 = vld [vmem:[#allocation2 + $0x8] sm:$0xff]  ;;  %v44_v10 = vld [vmem:[#allocation2] sm:$0xff]  ;;  %s88_s19 = sshll.u32 %s179_s0, 4  ;;  %s89_s19 = int_to_ptr.vmem [resolvable:$true] %s88_s19 }
   0xa   :  { %108 = vmatpush.msra.mxu1 %v50_v3 }
   0xb   :  { %69 = vmatpush.msra.mxu0 %v49_v4 }
   0xc   :  { %109 = vmatpush.msra.mxu1 %v49_v4 }
   0xd   :  { %70 = vmatpush.msra.mxu0 %v48_v5 }
   0xe   :  { %110 = vmatpush.msra.mxu1 %v48_v5 }
   0xf   :  { %71 = vmatpush.msra.mxu0 %v47_v7 }
  0x10   :  { %36 = vperm.xlu0 %121, %v29_v6   ;;  %111 = vmatpush.msra.mxu1 %v47_v7 }
  0x11   :  { %72 = vmatpush.msra.mxu0 %v46_v8 }
  0x12   :  { %112 = vmatpush.msra.mxu1 %v46_v8 }
  0x13   :  { %73 = vmatpush.msra.mxu0 %v45_v9 }
  0x14   :  { %113 = vmatpush.msra.mxu1 %v45_v9 }
  0x15   :  { %74 = vmatpush.msra.mxu0 %v44_v10 }
  0x16   :  { %114 = vmatpush.msra.mxu1 %v44_v10 }
  0x7a   :  { %v34_v13 = vpop.permute.xlu0 %33 }
  0x7b   :  { %vm38_vm1 = vcmp.eq.s32.totalorder %v34_v13, %v31_v12 }
  0x7c   :  { %v103_v15 = vsel %vm38_vm1, 1.0, %v178_v14 }
  0x7d   :  { %105 = vmatmul.msk.f32.vlgmr.msra.gmra.mxu0 %vm52_vm0, %v103_v15 }
  0x82   :  { %v37_v16 = vpop.permute.xlu0 %36 }
  0x83   :  { %vm39_vm2 = vcmp.eq.s32.totalorder %v37_v16, %v31_v12 }
  0x84   :  { %v104_v17 = vsel %vm39_vm2, 1.0, %v178_v14 }
  0x85   :  { %106 = vmatmul.msk.f32.vlgmr.msra.gmra.mxu1 %vm52_vm0, %v104_v17 }
  0xfa   :  { %v76_v18 = vpop.f32.mrf.mxu0 }
  0xfb   :  { %82 = vst [vmem:[#allocation5] sm:$0xff] %v76_v18 }
 0x102   :  { %v79_v19 = vpop.f32.mrf.mxu1 }
 0x103   :  { %83 = vst [vmem:[#allocation5 + $0x8] sm:$0xff] %v79_v19 }
 0x104   :  { %96 = dma.vmem_to_hbm [thread:$0]  %s89_s19, 256, %s91_s22, [#allocation4], %s175_s14, %s175_s14, %s176_s15  }
 0x105   :  { %172 = dma.done.wait [#allocation4], 256  }
 0x106   :  { %173 = vsyncadd [#allocation4], 4294967040 }
 0x107   :  { %101 = vsyncpa [#allocation3], 1 }
 0x108   :  { %102 = vsyncpa [#allocation4], 1 }

// kernel: tpu_custom_call.1
= control target key start
LH: loop header
LB: loop body
LE: loop exit
PB: predicated region body
PF: predicated region fallthrough
CT: control target
= control target key end

     0   :  { %7 = vsyncpa [#allocation3], 0  ;;  %s213_s0 = inlined_call_operand.vmem [shape: s32[16,1], index: 0, kind: input, shape index: {}]   ;;  %s214_s1 = inlined_call_operand.hbm [shape: f32[64,128], index: 1, kind: input, shape index: {}]   ;;  %s215_s2 = inlined_call_operand.hbm [shape: f32[16,128], index: 2, kind: output, shape index: {}]  }
   0x1   :  { %8 = vsyncpa [#allocation4], 0  ;;  %s15_s11 = sshll.u32 %s214_s1, 4  ;;  %s174_s12 = smov [#allocation2]   ;;  %s16_s11 = int_to_ptr.hbm [resolvable:$true] %s15_s11 }
   0x2   :  { %s17_s13 = sshll.u32 %s174_s12, 4  ;;  %s175_s14 = smov 128   ;;  %s18_s13 = int_to_ptr.vmem [resolvable:$true] %s17_s13 }
   0x3   :  { %s176_s15 = smov 8  }
   0x4   :  { %23 = dma.hbm_to_vmem [thread:$0]  %s16_s11, 1024, %s18_s13, [#allocation3], %s175_s14, %s175_s14, %s176_s15  }
   0x5   :  { %170 = dma.done.wait [#allocation3], 1024  }
   0x6   :  { %171 = vsyncadd [#allocation3], 4294966272  ;;  %v177_v0 = vmov 0   ;;  %v28_v1 = vld [vmem:[%s213_s0] sm:$0xff]  ;;  %v51_v2 = vld [vmem:[#allocation2 + $0x38] sm:$0xff]  ;;  %v30_v11 = vlaneseq  ;;  %vm52_vm0 = vcmask 523264  }
   0x7   :  { %121 = vset.pattern.permute.xlu0 %v177_v0  ;;  %67 = vmatpush.msra.mxu0 %v51_v2  ;;  %v50_v3 = vld [vmem:[#allocation2 + $0x30] sm:$0xff]  ;;  %v49_v4 = vld [vmem:[#allocation2 + $0x28] sm:$0xff]  ;;  %v48_v5 = vld [vmem:[#allocation2 + $0x20] sm:$0xff]  ;;  %v178_v14 = vmov 0.0   ;;  %s90_s22 = sshll.u32 %s215_s2, 4  ;;  %s91_s22 = int_to_ptr.hbm [resolvable:$true] %s90_s22 }
   0x8   :  { %33 = vperm.xlu0 %121, %v28_v1   ;;  %107 = vmatpush.msra.mxu1 %v51_v2  ;;  %v29_v6 = vld [vmem:[%s213_s0 + $0x8] sm:$0xff]  ;;  %v47_v7 = vld [vmem:[#allocation2 + $0x18] sm:$0xff]  ;;  %v46_v8 = vld [vmem:[#allocation2 + $0x10] sm:$0xff]  ;;  %v31_v12 = vand.u32 127, %v30_v11  ;;  %s179_s0 = smov [#allocation5]  }
   0x9   :  { %68 = vmatpush.msra.mxu0 %v50_v3  ;;  %v45_v9 = vld [vmem:[#allocation2 + $0x8] sm:$0xff]  ;;  %v44_v10 = vld [vmem:[#allocation2] sm:$0xff]  ;;  %s88_s19 = sshll.u32 %s179_s0, 4  ;;  %s89_s19 = int_to_ptr.vmem [resolvable:$true] %s88_s19 }
   0xa   :  { %108 = vmatpush.msra.mxu1 %v50_v3 }
   0xb   :  { %69 = vmatpush.msra.mxu0 %v49_v4 }
   0xc   :  { %109 = vmatpush.msra.mxu1 %v49_v4 }
   0xd   :  { %70 = vmatpush.msra.mxu0 %v48_v5 }
   0xe   :  { %110 = vmatpush.msra.mxu1 %v48_v5 }
   0xf   :  { %71 = vmatpush.msra.mxu0 %v47_v7 }
  0x10   :  { %36 = vperm.xlu0 %121, %v29_v6   ;;  %111 = vmatpush.msra.mxu1 %v47_v7 }
  0x11   :  { %72 = vmatpush.msra.mxu0 %v46_v8 }
  0x12   :  { %112 = vmatpush.msra.mxu1 %v46_v8 }
  0x13   :  { %73 = vmatpush.msra.mxu0 %v45_v9 }
  0x14   :  { %113 = vmatpush.msra.mxu1 %v45_v9 }
  0x15   :  { %74 = vmatpush.msra.mxu0 %v44_v10 }
  0x16   :  { %114 = vmatpush.msra.mxu1 %v44_v10 }
  0x7a   :  { %v34_v13 = vpop.permute.xlu0 %33 }
  0x7b   :  { %vm38_vm1 = vcmp.eq.s32.totalorder %v34_v13, %v31_v12 }
  0x7c   :  { %v103_v15 = vsel %vm38_vm1, 1.0, %v178_v14 }
  0x7d   :  { %105 = vmatmul.msk.f32.vlgmr.msra.gmra.mxu0 %vm52_vm0, %v103_v15 }
  0x82   :  { %v37_v16 = vpop.permute.xlu0 %36 }
  0x83   :  { %vm39_vm2 = vcmp.eq.s32.totalorder %v37_v16, %v31_v12 }
  0x84   :  { %v104_v17 = vsel %vm39_vm2, 1.0, %v178_v14 }
  0x85   :  { %106 = vmatmul.msk.f32.vlgmr.msra.gmra.mxu1 %vm52_vm0, %v104_v17 }
  0xfa   :  { %v76_v18 = vpop.f32.mrf.mxu0 }
  0xfb   :  { %82 = vst [vmem:[#allocation5] sm:$0xff] %v76_v18 }
 0x102   :  { %v79_v19 = vpop.f32.mrf.mxu1 }
 0x103   :  { %83 = vst [vmem:[#allocation5 + $0x8] sm:$0xff] %v79_v19 }
 0x104   :  { %96 = dma.vmem_to_hbm [thread:$0]  %s89_s19, 256, %s91_s22, [#allocation4], %s175_s14, %s175_s14, %s176_s15  }
 0x105   :  { %172 = dma.done.wait [#allocation4], 256  }
 0x106   :  { %173 = vsyncadd [#allocation4], 4294967040 }
 0x107   :  { %101 = vsyncpa [#allocation3], 1 }
 0x108   :  { %102 = vsyncpa [#allocation4], 1 }

</bundles_post_ra>
